<compile_context>
chip_gen: v7x
topology: tpu7x:2x2x1
jax: 0.10.0
libtpu: 0.0.40
codegen_flags: <defaults>
</compile_context>

<pallas_src>
import functools

import jax
import jax.numpy as jnp
from jax.experimental import pallas as pl
from jax.experimental.pallas import tpu as pltpu


def _round_up(n: int, m: int) -> int:
    return ((n + m - 1) // m) * m


def _mix32(v):
    """lowbias32-style 32-bit integer mixer (good avalanche, cheap on VPU)."""
    v = v ^ (v >> jnp.uint32(16))
    v = v * jnp.uint32(0x7FEB352D)
    v = v ^ (v >> jnp.uint32(15))
    v = v * jnp.uint32(0x846CA68B)
    v = v ^ (v >> jnp.uint32(16))
    return v


def _pixel_masking_kernel(seed_ref, x_ref, o_ref, *, keep_thresh: int, tile_rows: int):
    shape = x_ref.shape  # (tile_rows, 128)

    # Per-element global linear index -> unique random bits per element, no
    # repetition across grid tiles (program_id is folded into the counter).
    base = (pl.program_id(0) * (tile_rows * 128)).astype(jnp.uint32)
    row = jax.lax.broadcasted_iota(jnp.uint32, shape, 0)
    col = jax.lax.broadcasted_iota(jnp.uint32, shape, 1)
    idx = base + row * jnp.uint32(128) + col

    seed = seed_ref[0].astype(jnp.uint32)
    key = seed * jnp.uint32(0x9E3779B9) + jnp.uint32(0x85EBCA6B)

    bits = _mix32(idx ^ key)
    bits = _mix32(bits + key)

    # keep  <=>  U[0,1) < (1 - mask_ratio), decided on the top 24 random bits
    # entirely in integer space (no float convert / mul / add).
    keep = (bits >> jnp.uint32(8)) < jnp.uint32(keep_thresh)

    x = x_ref[...]
    o_ref[...] = jnp.where(keep, x, jnp.zeros_like(x))


def pixel_masking(x: jax.Array, *, mask_ratio: float, seed: int) -> jax.Array:
    """Apply random pixel masking: x * (U[0,1) < 1 - mask_ratio)."""
    orig_shape = x.shape
    total = int(x.size)
    flat = x.reshape(-1)

    # keep  <=>  rand < (1 - mask_ratio); compare top-24 random bits against
    # a static integer threshold.
    keep_thresh = int(round((1.0 - float(mask_ratio)) * (1 << 24)))
    keep_thresh = max(0, min(1 << 24, keep_thresh))

    # --- tiling: lane-dense (rows, 128) slab, ~2 MiB per input buffer -------
    dtype_bytes = jnp.dtype(x.dtype).itemsize
    rows = -(-total // 128)                                   # ceil div
    max_tile_rows = max(8, (2 * 1024 * 1024) // (128 * dtype_bytes))
    max_tile_rows = _round_up(max_tile_rows, 8)
    tile_rows = min(max_tile_rows, _round_up(rows, 8))
    rows_padded = _round_up(rows, tile_rows)
    padded_total = rows_padded * 128

    if padded_total != total:
        flat = jnp.pad(flat, (0, padded_total - total))
    x2 = flat.reshape(rows_padded, 128)

    grid = (rows_padded // tile_rows,)
    seed_arr = jnp.array([seed], dtype=jnp.int32)

    out = pl.pallas_call(
        functools.partial(
            _pixel_masking_kernel, keep_thresh=keep_thresh, tile_rows=tile_rows
        ),
        out_shape=jax.ShapeDtypeStruct((rows_padded, 128), x.dtype),
        grid=grid,
        in_specs=[
            pl.BlockSpec(memory_space=pltpu.SMEM),               # seed scalar
            pl.BlockSpec((tile_rows, 128), lambda i: (i, 0)),    # x tile
        ],
        out_specs=pl.BlockSpec((tile_rows, 128), lambda i: (i, 0)),
        compiler_params=pltpu.CompilerParams(
            dimension_semantics=("parallel",),                   # megacore on v7x
        ),
    )(seed_arr, x2)

    out_flat = out.reshape(-1)
    if padded_total != total:
        out_flat = out_flat[:total]
    return out_flat.reshape(orig_shape)


class PixelMaskingPallas:
    """Mirror of the PyTorch PixelMasking module (cfg.ratio / cfg.mask_value)."""

    def __init__(self, ratio: float, mask_value: float = 0.0):
        self.mask_ratio = ratio
        self.mask_value = mask_value  # unused in forward (same as the PyTorch module)

    def __call__(self, x: jax.Array, seed: int = 0) -> jax.Array:
        # TODO(synk): exact torch.rand bit-sequence cannot be reproduced (different
        # PRNG); the mask is statistically equivalent (i.i.d. Bernoulli(1-ratio)).
        return pixel_masking(x, mask_ratio=self.mask_ratio, seed=seed)


if __name__ == "__main__":
    key = jax.random.PRNGKey(0)
    # NCHW input, same convention as the PyTorch module.
    x = jax.random.normal(key, (2, 4, 16, 16), dtype=jnp.float32)

    module = PixelMaskingPallas(ratio=0.5, mask_value=0.0)
    y = module(x, seed=1234)
    y = jax.block_until_ready(y)

    # Sanity: output elements are either exactly x or exactly 0, and roughly
    # (1 - ratio) of elements survive.
    zeroed = jnp.sum(y == 0.0)
    kept_match = jnp.all((y == 0.0) | (y == x))
    assert bool(kept_match), "masked output must be elementwise x or 0"
    frac_zero = float(zeroed) / y.size
    assert 0.2 < frac_zero < 0.8, f"unexpected mask fraction {frac_zero}"

    print("KERNEL_OK")
</pallas_src>

<mosaic_0001>
module attributes {stable_mosaic.version = 11 : i64} {
  func.func @_pixel_masking_kernel(%arg0: i32, %arg1: memref<1xi32, #tpu.memory_space<smem>>, %arg2: memref<16x128xf32, #tpu.memory_space<vmem>>, %arg3: memref<16x128xf32, #tpu.memory_space<vmem>>) attributes {dimension_semantics = [#tpu.dimension_semantics<parallel>], iteration_bounds = array<i64: 1>, scalar_prefetch = 0 : i64, scratch_operands = 0 : i64, tpu.core_type = #tpu.core_type<tc>, window_params = [{transform_indices = @transform_0, window_bounds = array<i64: 1>}, {transform_indices = @transform_1, window_bounds = array<i64: 16, 128>}, {transform_indices = @transform_2, window_bounds = array<i64: 16, 128>}]} {
    %c2048_i32 = arith.constant 2048 : i32
    %0 = arith.muli %arg0, %c2048_i32 : i32
    %1 = tpu.iota {dimensions = array<i32: 0>} : vector<16x128xi32>
    %2 = tpu.iota {dimensions = array<i32: 1>} : vector<16x128xi32>
    %c128_i32 = arith.constant 128 : i32
    %3 = vector.broadcast %c128_i32 : i32 to vector<16x128xi32>
    %4 = arith.muli %1, %3 : vector<16x128xi32>
    %5 = vector.broadcast %0 : i32 to vector<16x128xi32>
    %6 = arith.addi %5, %4 : vector<16x128xi32>
    %7 = arith.addi %6, %2 : vector<16x128xi32>
    %c0 = arith.constant 0 : index
    %8 = memref.load %arg1[%c0] : memref<1xi32, #tpu.memory_space<smem>>
    %c-1640531527_i32 = arith.constant -1640531527 : i32
    %9 = arith.muli %8, %c-1640531527_i32 : i32
    %c-2048144789_i32 = arith.constant -2048144789 : i32
    %10 = arith.addi %9, %c-2048144789_i32 : i32
    %11 = vector.broadcast %10 : i32 to vector<16x128xi32>
    %12 = arith.xori %7, %11 : vector<16x128xi32>
    %c16_i32 = arith.constant 16 : i32
    %13 = vector.broadcast %c16_i32 : i32 to vector<16x128xi32>
    %14 = arith.shrui %12, %13 : vector<16x128xi32>
    %15 = arith.xori %12, %14 : vector<16x128xi32>
    %c2146121005_i32 = arith.constant 2146121005 : i32
    %16 = vector.broadcast %c2146121005_i32 : i32 to vector<16x128xi32>
    %17 = arith.muli %15, %16 : vector<16x128xi32>
    %c15_i32 = arith.constant 15 : i32
    %18 = vector.broadcast %c15_i32 : i32 to vector<16x128xi32>
    %19 = arith.shrui %17, %18 : vector<16x128xi32>
    %20 = arith.xori %17, %19 : vector<16x128xi32>
    %c-2073254261_i32 = arith.constant -2073254261 : i32
    %21 = vector.broadcast %c-2073254261_i32 : i32 to vector<16x128xi32>
    %22 = arith.muli %20, %21 : vector<16x128xi32>
    %c16_i32_0 = arith.constant 16 : i32
    %23 = vector.broadcast %c16_i32_0 : i32 to vector<16x128xi32>
    %24 = arith.shrui %22, %23 : vector<16x128xi32>
    %25 = arith.xori %22, %24 : vector<16x128xi32>
    %26 = vector.broadcast %10 : i32 to vector<16x128xi32>
    %27 = arith.addi %25, %26 : vector<16x128xi32>
    %c16_i32_1 = arith.constant 16 : i32
    %28 = vector.broadcast %c16_i32_1 : i32 to vector<16x128xi32>
    %29 = arith.shrui %27, %28 : vector<16x128xi32>
    %30 = arith.xori %27, %29 : vector<16x128xi32>
    %c2146121005_i32_2 = arith.constant 2146121005 : i32
    %31 = vector.broadcast %c2146121005_i32_2 : i32 to vector<16x128xi32>
    %32 = arith.muli %30, %31 : vector<16x128xi32>
    %c15_i32_3 = arith.constant 15 : i32
    %33 = vector.broadcast %c15_i32_3 : i32 to vector<16x128xi32>
    %34 = arith.shrui %32, %33 : vector<16x128xi32>
    %35 = arith.xori %32, %34 : vector<16x128xi32>
    %c-2073254261_i32_4 = arith.constant -2073254261 : i32
    %36 = vector.broadcast %c-2073254261_i32_4 : i32 to vector<16x128xi32>
    %37 = arith.muli %35, %36 : vector<16x128xi32>
    %c16_i32_5 = arith.constant 16 : i32
    %38 = vector.broadcast %c16_i32_5 : i32 to vector<16x128xi32>
    %39 = arith.shrui %37, %38 : vector<16x128xi32>
    %40 = arith.xori %37, %39 : vector<16x128xi32>
    %c8_i32 = arith.constant 8 : i32
    %41 = vector.broadcast %c8_i32 : i32 to vector<16x128xi32>
    %42 = arith.shrui %40, %41 : vector<16x128xi32>
    %c8388608_i32 = arith.constant 8388608 : i32
    %43 = vector.broadcast %c8388608_i32 : i32 to vector<16x128xi32>
    %44 = arith.cmpi ult, %42, %43 : vector<16x128xi32>
    %c0_6 = arith.constant 0 : index
    %c0_7 = arith.constant 0 : index
    %45 = vector.load %arg2[%c0_6, %c0_7] : memref<16x128xf32, #tpu.memory_space<vmem>>, vector<16x128xf32>
    %cst = arith.constant 0.000000e+00 : f32
    %46 = vector.broadcast %cst : f32 to vector<16x128xf32>
    %47 = arith.select %44, %45, %46 : vector<16x128xi1>, vector<16x128xf32>
    %c0_8 = arith.constant 0 : index
    %c0_9 = arith.constant 0 : index
    %48 = vector.load %arg3[%c0_8, %c0_9] : memref<16x128xf32, #tpu.memory_space<vmem>>, vector<16x128xf32>
    tpu.vector_store %arg3[%c0_8, %c0_9], %47 {strides = array<i32>} : memref<16x128xf32, #tpu.memory_space<vmem>>, vector<16x128xf32>,
    return
  }
  func.func @transform_0(%arg0: i32) -> i32 {
    %c0_i32 = arith.constant 0 : i32
    %c0_i32_0 = arith.constant 0 : i32
    return %c0_i32 : i32
  }
  func.func @transform_1(%arg0: i32) -> (i32, i32) {
    %c0_i32 = arith.constant 0 : i32
    %c0_i32_0 = arith.constant 0 : i32
    return %arg0, %c0_i32 : i32, i32
  }
  func.func @transform_2(%arg0: i32) -> (i32, i32) {
    %c0_i32 = arith.constant 0 : i32
    %c0_i32_0 = arith.constant 0 : i32
    return %arg0, %c0_i32 : i32, i32
  }
}

</mosaic_0001>

<bundles_post_ra>
// kernel: tpu_custom_call.1
= control target key start
LH: loop header
LB: loop body
LE: loop exit
PB: predicated region body
PF: predicated region fallthrough
CT: control target
= control target key end

     0   :  { %8 = vsyncpa [#allocation4], 0  ;;  %s211_s0 = inlined_call_operand.<no memory space> [shape: s32[1], index: 0, kind: input, shape index: {}]   ;;  %s212_s1 = inlined_call_operand.hbm [shape: f32[16,128], index: 1, kind: input, shape index: {}]   ;;  %s213_s2 = inlined_call_operand.hbm [shape: f32[16,128], index: 2, kind: output, shape index: {}]  }
   0x1   :  { %9 = vsyncpa [#allocation5], 0  ;;  %s159_s9 = smov [#allocation3]   ;;  %s111_s13 = scalar_lea.hbm %s212_s1, 256 }
   0x2   :  { %s17_s10 = sshll.u32 %s159_s9, 4  ;;  %p112_p0 = scmp.ne.s32.totalorder %s212_s1, %s111_s13  ;;  %s18_s10 = int_to_ptr.vmem [resolvable:$true] %s17_s10 }
   0x3   :  { %p115_p1 = scmp.lt.u32.totalorder %s111_s13, %s212_s1 }
   0x5   :  { %p117_p2 = pnand %p115_p1, %p112_p0 }
   0x7   :  { %120 = shalt.err (!%p117_p2)
}
   0x8   :  { %s121_s18 = scalar_lea.vmem %s18_s10, 256  ;;  %p126_p4 = scmp.lt.s32.totalorder %s18_s10, %s18_s10 }
   0x9   :  { %p122_p3 = scmp.ne.s32.totalorder %s18_s10, %s121_s18  ;;  %p127_p5 = scmp.lt.s32.totalorder %s121_s18, %s121_s18 }
   0xb   :  { %p128_p6 = por %p127_p5, %p126_p4 }
   0xd   :  { %p129_p7 = pnand %p128_p6, %p122_p3 }
   0xf   :  { %132 = shalt.err (!%p129_p7)
}
  0x10   :  { %s160_s19 = smov 128   ;;  %s161_s20 = smov 8  }
  0x11   :  { %23 = dma.hbm_to_vmem [thread:$0]  %s212_s1, 256, %s18_s10, [#allocation4], %s160_s19, %s160_s19, %s161_s20  }
  0x12   :  { %155 = dma.done.wait [#allocation4], 256  }
  0x13   :  { %156 = vsyncadd [#allocation4], 4294967040  ;;  %v28_v0 = vlaneseq  ;;  %s41_s25 = smul.u32 2654435769, %s211_s0  ;;  %v84_v45 = vld [vmem:[#allocation3] sm:$0xff]  ;;  %s162_s0 = smov [#allocation6]  }
  0x14   :  { %s95_s1 = sshll.u32 %s162_s0, 4  ;;  %v85_v48 = vld [vmem:[#allocation3 + $0x8] sm:$0xff]  ;;  %s96_s1 = int_to_ptr.vmem [resolvable:$true] %s95_s1 }
  0x15   :  { %v29_v1 = vshrl.u32 %v28_v0, 7  ;;  %v32_v2 = vand.u32 127, %v28_v0  ;;  %s42_s26 = sadd.s32 2246822507, %s41_s25  ;;  %s133_s27 = scalar_lea.vmem %s96_s1, 256 }
  0x16   :  { %v43_v5 = vstv %s42_s26  ;;  %p134_p8 = scmp.ne.s32.totalorder %s96_s1, %s133_s27  ;;  %p138_p9 = scmp.lt.s32.totalorder %s96_s1, %s96_s1 }
  0x17   :  { %v30_v3 = vadd.s32 8, %v29_v1  ;;  %v33_v4 = vmul.u32 128, %v29_v1  ;;  %p139_p10 = scmp.lt.s32.totalorder %s133_s27, %s133_s27 }
  0x19   :  { %v34_v6 = vmul.u32 128, %v30_v3  ;;  %v38_v7 = vadd.s32 %v33_v4, %v32_v2  ;;  %p140_p11 = por %p139_p10, %p138_p9 }
  0x1b   :  { %v39_v8 = vadd.s32 %v34_v6, %v32_v2  ;;  %v44_v9 = vxor.u32 %v43_v5, %v38_v7  ;;  %p141_p12 = pnand %p140_p11, %p134_p8 }
  0x1d   :  { %v45_v10 = vxor.u32 %v43_v5, %v39_v8  ;;  %v46_v11 = vshrl.u32 %v44_v9, 16 }
  0x1f   :  { %v48_v12 = vxor.u32 %v46_v11, %v44_v9  ;;  %v47_v13 = vshrl.u32 %v45_v10, 16 }
  0x21   :  { %v50_v14 = vmul.u32 2146121005, %v48_v12  ;;  %v49_v15 = vxor.u32 %v47_v13, %v45_v10 }
  0x23   :  { %v52_v16 = vshrl.u32 %v50_v14, 15  ;;  %v51_v17 = vmul.u32 2146121005, %v49_v15 }
  0x25   :  { %v54_v18 = vxor.u32 %v52_v16, %v50_v14  ;;  %v53_v19 = vshrl.u32 %v51_v17, 15 }
  0x27   :  { %v56_v20 = vmul.u32 2221713035, %v54_v18  ;;  %v55_v21 = vxor.u32 %v53_v19, %v51_v17 }
  0x29   :  { %v58_v22 = vshrl.u32 %v56_v20, 16  ;;  %v57_v23 = vmul.u32 2221713035, %v55_v21 }
  0x2b   :  { %v60_v24 = vxor.u32 %v58_v22, %v56_v20  ;;  %v59_v25 = vshrl.u32 %v57_v23, 16 }
  0x2d   :  { %v62_v26 = vadd.s32 %v60_v24, %v43_v5  ;;  %v61_v27 = vxor.u32 %v59_v25, %v57_v23 }
  0x2f   :  { %v64_v28 = vshrl.u32 %v62_v26, 16  ;;  %v63_v29 = vadd.s32 %v61_v27, %v43_v5 }
  0x31   :  { %v66_v30 = vxor.u32 %v64_v28, %v62_v26  ;;  %v65_v31 = vshrl.u32 %v63_v29, 16 }
  0x33   :  { %v68_v32 = vmul.u32 2146121005, %v66_v30  ;;  %v67_v33 = vxor.u32 %v65_v31, %v63_v29 }
  0x35   :  { %v70_v34 = vshrl.u32 %v68_v32, 15  ;;  %v69_v35 = vmul.u32 2146121005, %v67_v33 }
  0x37   :  { %v72_v36 = vxor.u32 %v70_v34, %v68_v32  ;;  %v71_v37 = vshrl.u32 %v69_v35, 15 }
  0x39   :  { %v74_v38 = vmul.u32 2221713035, %v72_v36  ;;  %v73_v39 = vxor.u32 %v71_v37, %v69_v35 }
  0x3b   :  { %v76_v40 = vshrl.u32 %v74_v38, 16  ;;  %v75_v41 = vmul.u32 2221713035, %v73_v39 }
  0x3d   :  { %v78_v42 = vxor.u32 %v76_v40, %v74_v38  ;;  %v77_v43 = vshrl.u32 %v75_v41, 16 }
  0x3f   :  { %v80_v44 = vshrl.u32 %v78_v42, 8  ;;  %v79_v46 = vxor.u32 %v77_v43, %v75_v41 }
  0x41   :  { %vm82_vm0 = vcmp.lt.u32.totalorder %v80_v44, 8388608  ;;  %v81_v47 = vshrl.u32 %v79_v46, 8 }
  0x42   :  { %v86_v49 = vsel %vm82_vm0, %v84_v45, 0.0 }
  0x43   :  { %88 = vst [vmem:[#allocation6] sm:$0xff] %v86_v49  ;;  %vm83_vm1 = vcmp.lt.u32.totalorder %v81_v47, 8388608 }
  0x44   :  { %v87_v50 = vsel %vm83_vm1, %v85_v48, 0.0 }
  0x45   :  { %89 = vst [vmem:[#allocation6 + $0x8] sm:$0xff] %v87_v50 }
  0x46   :  { %144 = shalt.err (!%p141_p12)
}
  0x47   :  { %s145_s30 = scalar_lea.hbm %s213_s2, 256 }
  0x48   :  { %p146_p13 = scmp.ne.s32.totalorder %s213_s2, %s145_s30  ;;  %p149_p0 = scmp.lt.u32.totalorder %s145_s30, %s213_s2 }
  0x4a   :  { %p151_p1 = pnand %p149_p0, %p146_p13 }
  0x4c   :  { %154 = shalt.err (!%p151_p1)
}
  0x4d   :  { %101 = dma.vmem_to_hbm [thread:$0]  %s96_s1, 256, %s213_s2, [#allocation5], %s160_s19, %s160_s19, %s161_s20  }
  0x4e   :  { %157 = dma.done.wait [#allocation5], 256  }
  0x4f   :  { %158 = vsyncadd [#allocation5], 4294967040 }
  0x50   :  { %105 = vsyncpa [#allocation4], 1 }
  0x51   :  { %106 = vsyncpa [#allocation5], 1 }

</bundles_post_ra>
